<compile_context>
chip_gen: v5e
topology: v5e:2x2
jax: 0.10.0
libtpu: 0.0.40
codegen_flags: <defaults>
</compile_context>

<pallas_src>
import jax
import jax.numpy as jnp
from jax.experimental import pallas as pl
from jax.experimental.pallas import tpu as pltpu


def _linear_kernel(xt_ref, w_ref, b_ref, ot_ref):
    # xt_ref: [2, B]  f32 in VMEM (batch on the lane axis)
    # w_ref:  [2]     f32 in SMEM (PyTorch weight [1,2] flattened: w[k] = W[0,k])
    # b_ref:  [1]     f32 in SMEM
    # ot_ref: [1, B]  f32 in VMEM
    w0 = w_ref[0]
    w1 = w_ref[1]
    b = b_ref[0]
    # Pure VPU multiply-add, f32 throughout, single store.
    ot_ref[...] = xt_ref[0:1, :] * w0 + xt_ref[1:2, :] * w1 + b


def mlp_forward(x, w, b):
    """x: [B, 2] f32, w: [2] f32 (flattened PyTorch weight [1,2]), b: [1] f32.

    Returns [B, 1] f32, matching nn.Linear(2, 1)(x).
    """
    B = x.shape[0]
    xt = x.T  # [2, B]: batch on the lane (fast) axis

    yt = pl.pallas_call(
        _linear_kernel,
        out_shape=jax.ShapeDtypeStruct((1, B), jnp.float32),
        in_specs=[
            pl.BlockSpec(memory_space=pltpu.MemorySpace.VMEM),   # xt, whole array
            pl.BlockSpec(memory_space=pltpu.MemorySpace.SMEM),   # weight scalars
            pl.BlockSpec(memory_space=pltpu.MemorySpace.SMEM),   # bias scalar
        ],
        out_specs=pl.BlockSpec(memory_space=pltpu.MemorySpace.VMEM),
    )(xt, w, b)

    return yt.T  # [B, 1]


def reference_forward(x, w, b):
    # x @ W.T + b with W = w[None, :]  (PyTorch layout [out=1, in=2])
    return x @ w[:, None] + b[None, :]


if __name__ == "__main__":
    key = jax.random.PRNGKey(0)
    k_x, k_w, k_b = jax.random.split(key, 3)

    batch = 8
    in_features, out_features = 2, 1

    # Deterministic parameter init (mimics PyTorch Linear's U(-1/sqrt(fan_in), +..)).
    bound = 1.0 / jnp.sqrt(in_features)
    # PyTorch stores weight as [out, in] = [1, 2]; we keep it flattened as [2].
    w = jax.random.uniform(k_w, (in_features,),
                           minval=-bound, maxval=bound, dtype=jnp.float32)
    b = jax.random.uniform(k_b, (out_features,),
                           minval=-bound, maxval=bound, dtype=jnp.float32)

    x = jax.random.normal(k_x, (batch, in_features), dtype=jnp.float32)

    y = mlp_forward(x, w, b)
    y = jax.block_until_ready(y)

    y_ref = reference_forward(x, w, b)
    assert y.shape == (batch, out_features)
    assert jnp.allclose(y, y_ref, atol=1e-5, rtol=1e-5)

    print("KERNEL_OK")
</pallas_src>

<mosaic_0001>
module attributes {stable_mosaic.version = 11 : i64} {
  func.func @_linear_kernel(%arg0: memref<2x8xf32, #tpu.memory_space<vmem>>, %arg1: memref<2xf32, #tpu.memory_space<smem>>, %arg2: memref<1xf32, #tpu.memory_space<smem>>, %arg3: memref<1x8xf32, #tpu.memory_space<vmem>>) attributes {dimension_semantics = [], scalar_prefetch = 0 : i64, scratch_operands = 0 : i64, tpu.core_type = #tpu.core_type<tc>} {
    %c0 = arith.constant 0 : index
    %0 = memref.load %arg1[%c0] : memref<2xf32, #tpu.memory_space<smem>>
    %c1 = arith.constant 1 : index
    %1 = memref.load %arg1[%c1] : memref<2xf32, #tpu.memory_space<smem>>
    %c0_0 = arith.constant 0 : index
    %2 = memref.load %arg2[%c0_0] : memref<1xf32, #tpu.memory_space<smem>>
    %c0_1 = arith.constant 0 : index
    %c0_2 = arith.constant 0 : index
    %3 = vector.load %arg0[%c0_1, %c0_2] : memref<2x8xf32, #tpu.memory_space<vmem>>, vector<1x8xf32>
    %4 = vector.broadcast %0 : f32 to vector<1x8xf32>
    %5 = arith.mulf %3, %4 : vector<1x8xf32>
    %c1_3 = arith.constant 1 : index
    %c0_4 = arith.constant 0 : index
    %6 = vector.load %arg0[%c1_3, %c0_4] : memref<2x8xf32, #tpu.memory_space<vmem>>, vector<1x8xf32>
    %7 = vector.broadcast %1 : f32 to vector<1x8xf32>
    %8 = arith.mulf %6, %7 : vector<1x8xf32>
    %9 = arith.addf %5, %8 : vector<1x8xf32>
    %10 = vector.broadcast %2 : f32 to vector<1x8xf32>
    %11 = arith.addf %9, %10 : vector<1x8xf32>
    %c0_5 = arith.constant 0 : index
    %c0_6 = arith.constant 0 : index
    %12 = vector.load %arg3[%c0_5, %c0_6] : memref<1x8xf32, #tpu.memory_space<vmem>>, vector<1x8xf32>
    tpu.vector_store %arg3[%c0_5, %c0_6], %11 {strides = array<i32>} : memref<1x8xf32, #tpu.memory_space<vmem>>, vector<1x8xf32>,
    return
  }
}

</mosaic_0001>

<bundles_post_ra>
// kernel: tpu_custom_call.1
= control target key start
LH: loop header
LB: loop body
LE: loop exit
PB: predicated region body
PF: predicated region fallthrough
CT: control target
= control target key end

     0   :  { %9 = vsyncpa [#allocation5], 0  ;;  %s140_s0 = inlined_call_operand.vmem [shape: f32[2,8], index: 0, kind: input, shape index: {}]   ;;  %s141_s1 = inlined_call_operand.hbm [shape: f32[2], index: 1, kind: input, shape index: {}]   ;;  %s142_s2 = inlined_call_operand.<no memory space> [shape: f32[1], index: 2, kind: input, shape index: {}]   ;;  %s143_s3 = inlined_call_operand.hbm [shape: f32[1,8], index: 3, kind: output, shape index: {}]  }
   0x1   :  { %10 = vsyncpa [#allocation4], 0  ;;  %s18_s14 = sshll.u32 %s141_s1, 4  ;;  %s103_s15 = smov [#allocation3]   ;;  %s19_s14 = int_to_ptr.hbm [resolvable:$true] %s18_s14 }
   0x2   :  { %21 = dma.hbm_to_smem %s19_s14, 16, %s103_s15, [#allocation5]  }
   0x3   :  { %99 = dma.done.wait [#allocation5], 16  }
   0x4   :  { %100 = vsyncadd [#allocation5], 4294967280 }
   0x5   :  { %28 = sfence }
   0x6   :  { %s29_s16 = sld [smem:[#allocation3]]  ;;  %v32_v0 = vld [vmem:[%s140_s0] sm:$0x1]  ;;  %v35_v1 = vld [vmem:[%s140_s0 + $0x1] sm:$0x1]  ;;  %v39_v6 = vstv %s142_s2  ;;  %s104_s23 = smov [#allocation6]  }
   0x7   :  { %s60_s17 = sld [smem:[#allocation3 + $0x1]]  ;;  %s48_s24 = sshll.u32 %s104_s23, 4  ;;  %vm41_vm0 = vcmask 57344   ;;  %s49_s24 = int_to_ptr.vmem [resolvable:$true] %s48_s24 }
   0x8   :  { %s50_s27 = sshll.u32 %s143_s3, 4  ;;  %s51_s27 = int_to_ptr.hbm [resolvable:$true] %s50_s27 }
   0xc   :  { %v33_v2 = vstv %s29_s16 }
   0xd   :  { %v34_v3 = vmul.f32 %v33_v2, %v32_v0  ;;  %v36_v4 = vstv %s60_s17 }
   0xe   :  { %v37_v5 = vmul.f32 %v36_v4, %v35_v1 }
  0x10   :  { %v38_v7 = vadd.f32 %v37_v5, %v34_v3 }
  0x12   :  { %v40_v8 = vadd.f32 %v39_v6, %v38_v7 }
  0x14   :  { %42 = vst.msk [vmem:[#allocation6] sm:$0x1] %vm41_vm0, %v40_v8 }
  0x15   :  { %53 = dma.vmem_to_hbm [thread:$0]  %s49_s24, 16, %s51_s27, [#allocation4]  }
  0x16   :  { %101 = dma.done.wait [#allocation4], 16  }
  0x17   :  { %102 = vsyncadd [#allocation4], 4294967280 }
  0x18   :  { %58 = vsyncpa [#allocation4], 1 }
  0x19   :  { %59 = vsyncpa [#allocation5], 1 }

</bundles_post_ra>
